<compile_context>
chip_gen: v7x
topology: tpu7x:2x2x1
jax: 0.10.0
libtpu: 0.0.40
codegen_flags: <defaults>
</compile_context>

<pallas_src>
import functools
import math

import jax
import jax.numpy as jnp
from jax.experimental import pallas as pl
from jax.experimental.pallas import tpu as pltpu


def _residual_linear_kernel(x_ref, wt_ref, b_ref, o_ref, *, matmul_dtype):
    """One batch tile: o = x + x @ Wt + b  (Wt is the pre-transposed weight)."""
    x = x_ref[...]
    # MXU matmul, canonical contraction (contract dim 1 of x with dim 0 of Wt).
    y = jnp.dot(
        x.astype(matmul_dtype),
        wt_ref[...].astype(matmul_dtype),
        preferred_element_type=jnp.float32,
    )
    # Residual + bias epilogue in f32 on the VPU; single cast on store.
    o_ref[...] = (
        x.astype(jnp.float32) + y + b_ref[...].astype(jnp.float32)
    ).astype(o_ref.dtype)


def _vmem_capacity_bytes():
    try:
        return int(pltpu.get_tpu_info().vmem_capacity_bytes)
    except Exception:
        return 64 * 1024 * 1024  # conservative default: v7x per-TensorCore VMEM


def _largest_dividing_tile(rows, cap):
    """Largest multiple-of-8 tile <= cap that evenly divides `rows`."""
    t = (min(cap, rows) // 8) * 8
    while t > 8 and rows % t != 0:
        t -= 8
    return max(t, 8)


def residual_block(x, w, b, *, matmul_dtype=None):
    """out = x + (x @ w.T + b), matching nn.Linear(size, size) + residual.

    x: [B, F] float32
    w: [F, F] float32  (PyTorch Linear layout: (out_features, in_features))
    b: [F]    float32
    matmul_dtype: optional MXU-operand dtype (e.g. jnp.bfloat16 on v6e/v7x for
      2-3x matmul throughput and half the weight DMA/VMEM at large F).
      Accumulation and the residual/bias add remain f32.  Default keeps f32.
    """
    B, F = x.shape
    if matmul_dtype is None:
        matmul_dtype = x.dtype
    wt_dtype = jnp.dtype(matmul_dtype)

    # ---- lane-dense feature dim, 8-aligned batch ----------------------------
    Fp = pl.cdiv(F, 128) * 128
    Bp = pl.cdiv(B, 8) * 8

    # ---- generation-aware VMEM budget & row-tile selection -------------------
    vmem_cap = _vmem_capacity_bytes()                       # 64 MiB v7x, 128 MiB v5e/v6e
    budget = min(int(vmem_cap * 0.85), 100 * 1024 * 1024)   # ~54 MiB v7x, ~100 MiB v5e/v6e

    itemsize = jnp.dtype(x.dtype).itemsize
    w_bytes = Fp * Fp * wt_dtype.itemsize           # resident weight (single-buffered)
    bias_bytes = Fp * itemsize
    io_bytes_per_row = 2 * 2 * Fp * itemsize        # double-buffered x tile + out tile
    headroom = 2 * 1024 * 1024

    avail = budget - w_bytes - 2 * bias_bytes - headroom
    if avail < 8 * io_bytes_per_row:
        # TODO(synk): resident-weight design no longer fits; needs the 3-D
        # (M, N, K) tiled-weight path described above.
        raise NotImplementedError(
            "feature dim too large for the VMEM-resident-weight kernel")
    tm_budget = (avail // io_bytes_per_row) // 8 * 8

    # 512-1024 row tiles reach ~85% of HBM roofline (vs ~63% at 256); keep the
    # f32 epilogue stores reasonable on v5e by capping at 512 for large F.
    tm_target = 1024 if Fp <= 512 else 512
    tm_cap = min(tm_target, tm_budget)
    # Prefer >= ~4 grid steps (>= 2 per TensorCore after the megacore split) so
    # each core overlaps DMA with compute, as long as tiles stay >= 256 rows.
    if Bp >= 4 * 256:
        tm_cap = min(tm_cap, max(256, (Bp // 4) // 8 * 8))

    # Only 8-row alignment is required for correctness; avoid padding B to a
    # multiple of tm (full extra HBM pass over x).  Pick the largest tile that
    # divides the 8-aligned batch; only if the batch is pathologically awkward
    # (no reasonable divisor), align it to 128 rows instead.
    tm = _largest_dividing_tile(Bp, tm_cap)
    if tm < min(128, Bp):
        Bp = pl.cdiv(Bp, 128) * 128
        tm = _largest_dividing_tile(Bp, tm_cap)

    # ---- padding (only when needed; zero rows/cols are inert for this op) ----
    if (Bp, Fp) != (B, F):
        x_p = jnp.pad(x, ((0, Bp - B), (0, Fp - F)))
        w_p = jnp.pad(w, ((0, Fp - F), (0, Fp - F)))
        b_p = jnp.pad(b, (0, Fp - F))
    else:
        x_p, w_p, b_p = x, w, b

    # Transpose the PyTorch (out,in) weight ONCE outside the hot loop (one tiny
    # F x F pass) so the kernel contracts with the canonical MXU layout; store
    # it in the matmul dtype (halves weight DMA + VMEM when bf16 is requested).
    wt = w_p.T.astype(wt_dtype)
    b2 = b_p.reshape(1, Fp)

    grid = (Bp // tm,)
    cost = pl.CostEstimate(
        flops=2 * Bp * Fp * Fp + 2 * Bp * Fp,
        transcendentals=0,
        bytes_accessed=2 * Bp * Fp * itemsize + w_bytes + bias_bytes,
    )
    kernel = functools.partial(_residual_linear_kernel, matmul_dtype=wt_dtype)

    def _run(single_buffer_params):
        # Grid-invariant weight/bias: request a single pipeline buffer instead
        # of the default double-buffering (halves resident-weight VMEM).
        pm = {"pipeline_mode": pl.Buffered(1)} if single_buffer_params else {}
        w_bufs = 1 if single_buffer_params else 2
        vmem_bytes = (w_bufs * w_bytes + 2 * bias_bytes
                      + 2 * 2 * tm * Fp * itemsize + headroom)
        vmem_bytes = min(max(vmem_bytes, 32 * 1024 * 1024), budget)

        call = pl.pallas_call(
            kernel,
            out_shape=jax.ShapeDtypeStruct((Bp, Fp), x.dtype),
            grid_spec=pl.GridSpec(
                grid=grid,
                in_specs=[
                    pl.BlockSpec((tm, Fp), lambda i: (i, 0)),         # x: batch-tiled, pipelined
                    pl.BlockSpec((Fp, Fp), lambda i: (0, 0), **pm),   # W^T: VMEM-resident
                    pl.BlockSpec((1, Fp), lambda i: (0, 0), **pm),    # bias: VMEM-resident
                ],
                out_specs=pl.BlockSpec((tm, Fp), lambda i: (i, 0)),
            ),
            compiler_params=pltpu.CompilerParams(
                dimension_semantics=("parallel",),   # megacore split of the batch axis
                vmem_limit_bytes=int(vmem_bytes),
            ),
            cost_estimate=cost,
        )
        return jax.block_until_ready(call(x_p, wt, b2))

    try:
        out = _run(True)
    except Exception:
        # This jax build rejected pipeline_mode=pl.Buffered(1); fall back to the
        # default double-buffered pipeline (identical math, 2x weight VMEM).
        out = _run(False)

    if (Bp, Fp) != (B, F):
        out = out[:B, :F]
    return out


if __name__ == "__main__":
    # Small, lane-dense demo shapes (multi-tile grid so pipelining is exercised).
    batch, size = 1024, 128

    key = jax.random.PRNGKey(0)
    kx, kw, kb = jax.random.split(key, 3)

    # Deterministic parameter init mimicking nn.Linear's default:
    # uniform(-1/sqrt(size), 1/sqrt(size)) for both weight and bias.
    bound = 1.0 / math.sqrt(size)
    w = jax.random.uniform(kw, (size, size), jnp.float32, -bound, bound)
    b = jax.random.uniform(kb, (size,), jnp.float32, -bound, bound)
    x = jax.random.normal(kx, (batch, size), jnp.float32)

    out = residual_block(x, w, b)
    out = jax.block_until_ready(out)

    # Pure-JAX reference check (same semantics as the PyTorch forward).
    ref = x + (x @ w.T + b)
    assert out.shape == (batch, size)
    assert jnp.allclose(out, ref, atol=1e-5, rtol=1e-5)

    print("KERNEL_OK")
</pallas_src>

<mosaic_0001>
module attributes {stable_mosaic.version = 11 : i64} {
  func.func @_residual_linear_kernel(%arg0: i32, %arg1: memref<256x128xf32, #tpu.memory_space<vmem>>, %arg2: memref<128x128xf32, #tpu.memory_space<vmem>>, %arg3: memref<1x128xf32, #tpu.memory_space<vmem>>, %arg4: memref<256x128xf32, #tpu.memory_space<vmem>>) attributes {dimension_semantics = [#tpu.dimension_semantics<parallel>], iteration_bounds = array<i64: 4>, scalar_prefetch = 0 : i64, scratch_operands = 0 : i64, tpu.core_type = #tpu.core_type<tc>, window_params = [{transform_indices = @transform_0, window_bounds = array<i64: 256, 128>}, {pipeline_mode = #tpu.pipeline_mode<synchronous>, transform_indices = @transform_1, window_bounds = array<i64: 128, 128>}, {pipeline_mode = #tpu.pipeline_mode<synchronous>, transform_indices = @transform_2, window_bounds = array<i64: 1, 128>}, {transform_indices = @transform_3, window_bounds = array<i64: 256, 128>}]} {
    %c0 = arith.constant 0 : index
    %c0_0 = arith.constant 0 : index
    %0 = vector.load %arg1[%c0, %c0_0] : memref<256x128xf32, #tpu.memory_space<vmem>>, vector<256x128xf32>
    %c0_1 = arith.constant 0 : index
    %c0_2 = arith.constant 0 : index
    %1 = vector.load %arg2[%c0_1, %c0_2] : memref<128x128xf32, #tpu.memory_space<vmem>>, vector<128x128xf32>
    %cst = arith.constant dense<0.000000e+00> : vector<256x128xf32>
    %2 = tpu.matmul %0, %1, %cst {dimension_numbers = #tpu.dot_dimension_numbers<[1], [0], [0], [1], [0, 0, 1, 1], [], []>} : vector<256x128xf32>, vector<128x128xf32>, vector<256x128xf32> -> vector<256x128xf32>
    %3 = arith.addf %0, %2 : vector<256x128xf32>
    %c0_3 = arith.constant 0 : index
    %c0_4 = arith.constant 0 : index
    %4 = vector.load %arg3[%c0_3, %c0_4] : memref<1x128xf32, #tpu.memory_space<vmem>>, vector<1x128xf32>
    %5 = vector.broadcast %4 : vector<1x128xf32> to vector<256x128xf32>
    %6 = arith.addf %3, %5 : vector<256x128xf32>
    %c0_5 = arith.constant 0 : index
    %c0_6 = arith.constant 0 : index
    %7 = vector.load %arg4[%c0_5, %c0_6] : memref<256x128xf32, #tpu.memory_space<vmem>>, vector<256x128xf32>
    tpu.vector_store %arg4[%c0_5, %c0_6], %6 {strides = array<i32>} : memref<256x128xf32, #tpu.memory_space<vmem>>, vector<256x128xf32>,
    return
  }
  func.func @transform_0(%arg0: i32) -> (i32, i32) {
    %c0_i32 = arith.constant 0 : i32
    %c0_i32_0 = arith.constant 0 : i32
    return %arg0, %c0_i32 : i32, i32
  }
  func.func @transform_1(%arg0: i32) -> (i32, i32) {
    %c0_i32 = arith.constant 0 : i32
    %c0_i32_0 = arith.constant 0 : i32
    %c0_i32_1 = arith.constant 0 : i32
    return %c0_i32, %c0_i32_0 : i32, i32
  }
  func.func @transform_2(%arg0: i32) -> (i32, i32) {
    %c0_i32 = arith.constant 0 : i32
    %c0_i32_0 = arith.constant 0 : i32
    %c0_i32_1 = arith.constant 0 : i32
    return %c0_i32, %c0_i32_0 : i32, i32
  }
  func.func @transform_3(%arg0: i32) -> (i32, i32) {
    %c0_i32 = arith.constant 0 : i32
    %c0_i32_0 = arith.constant 0 : i32
    return %arg0, %c0_i32 : i32, i32
  }
}

module attributes {stable_mosaic.version = 11 : i64} {
  func.func @_residual_linear_kernel(%arg0: i32, %arg1: memref<256x128xf32, #tpu.memory_space<vmem>>, %arg2: memref<128x128xf32, #tpu.memory_space<vmem>>, %arg3: memref<1x128xf32, #tpu.memory_space<vmem>>, %arg4: memref<256x128xf32, #tpu.memory_space<vmem>>) attributes {dimension_semantics = [#tpu.dimension_semantics<parallel>], iteration_bounds = array<i64: 4>, scalar_prefetch = 0 : i64, scratch_operands = 0 : i64, tpu.core_type = #tpu.core_type<tc>, window_params = [{transform_indices = @transform_0, window_bounds = array<i64: 256, 128>}, {pipeline_mode = #tpu.pipeline_mode<synchronous>, transform_indices = @transform_1, window_bounds = array<i64: 128, 128>}, {pipeline_mode = #tpu.pipeline_mode<synchronous>, transform_indices = @transform_2, window_bounds = array<i64: 1, 128>}, {transform_indices = @transform_3, window_bounds = array<i64: 256, 128>}]} {
    %c0 = arith.constant 0 : index
    %c0_0 = arith.constant 0 : index
    %0 = vector.load %arg1[%c0, %c0_0] : memref<256x128xf32, #tpu.memory_space<vmem>>, vector<256x128xf32>
    %c0_1 = arith.constant 0 : index
    %c0_2 = arith.constant 0 : index
    %1 = vector.load %arg2[%c0_1, %c0_2] : memref<128x128xf32, #tpu.memory_space<vmem>>, vector<128x128xf32>
    %cst = arith.constant dense<0.000000e+00> : vector<256x128xf32>
    %2 = tpu.matmul %0, %1, %cst {dimension_numbers = #tpu.dot_dimension_numbers<[1], [0], [0], [1], [0, 0, 1, 1], [], []>} : vector<256x128xf32>, vector<128x128xf32>, vector<256x128xf32> -> vector<256x128xf32>
    %3 = arith.addf %0, %2 : vector<256x128xf32>
    %c0_3 = arith.constant 0 : index
    %c0_4 = arith.constant 0 : index
    %4 = vector.load %arg3[%c0_3, %c0_4] : memref<1x128xf32, #tpu.memory_space<vmem>>, vector<1x128xf32>
    %5 = vector.broadcast %4 : vector<1x128xf32> to vector<256x128xf32>
    %6 = arith.addf %3, %5 : vector<256x128xf32>
    %c0_5 = arith.constant 0 : index
    %c0_6 = arith.constant 0 : index
    %7 = vector.load %arg4[%c0_5, %c0_6] : memref<256x128xf32, #tpu.memory_space<vmem>>, vector<256x128xf32>
    tpu.vector_store %arg4[%c0_5, %c0_6], %6 {strides = array<i32>} : memref<256x128xf32, #tpu.memory_space<vmem>>, vector<256x128xf32>,
    return
  }
  func.func @transform_0(%arg0: i32) -> (i32, i32) {
    %c0_i32 = arith.constant 0 : i32
    %c0_i32_0 = arith.constant 0 : i32
    return %arg0, %c0_i32 : i32, i32
  }
  func.func @transform_1(%arg0: i32) -> (i32, i32) {
    %c0_i32 = arith.constant 0 : i32
    %c0_i32_0 = arith.constant 0 : i32
    %c0_i32_1 = arith.constant 0 : i32
    return %c0_i32, %c0_i32_0 : i32, i32
  }
  func.func @transform_2(%arg0: i32) -> (i32, i32) {
    %c0_i32 = arith.constant 0 : i32
    %c0_i32_0 = arith.constant 0 : i32
    %c0_i32_1 = arith.constant 0 : i32
    return %c0_i32, %c0_i32_0 : i32, i32
  }
  func.func @transform_3(%arg0: i32) -> (i32, i32) {
    %c0_i32 = arith.constant 0 : i32
    %c0_i32_0 = arith.constant 0 : i32
    return %arg0, %c0_i32 : i32, i32
  }
}

</mosaic_0001>

<bundles_post_ra>
// kernel: tpu_custom_call.1
= control target key start
LH: loop header
LB: loop body
LE: loop exit
PB: predicated region body
PF: predicated region fallthrough
CT: control target
= control target key end

     0   :  { %8 = vsyncpa [#allocation3], 0  ;;  %s1528_s0 = inlined_call_operand.hbm [shape: f32[1024,128], index: 0, kind: input, shape index: {}]   ;;  %s1529_s1 = inlined_call_operand.hbm [shape: f32[128,128], index: 1, kind: input, shape index: {}]   ;;  %s1530_s2 = inlined_call_operand.vmem [shape: f32[1,128], index: 2, kind: input, shape index: {}]   ;;  %s1531_s3 = inlined_call_operand.hbm [shape: f32[1024,128], index: 3, kind: output, shape index: {}]  }
   0x1   :  { %10 = vsyncpa [#allocation3 + $0x1], 0 }
   0x2   :  { %11 = vsyncpa [#allocation6], 0 }
   0x3   :  { %12 = vsyncpa [#allocation4], 0 }
   0x4   :  { %14 = vsyncpa [#allocation4 + $0x1], 0  ;;  %s1092_s12 = smov 0   ;;  %s1094_s13 = smov 0  }
   0x5   :  { %s1096_s14 = smov 0   ;;  %s1098_s15 = smov 0  }
   0x6 LB: > { %s1113_s16 = sadd.s32 4294967295, %s1063_s15   ;;  %s679_s17 = sadd.s32 4294967294, %s1063_s15   ;;  %s1063_s15 = sphi %s1098_s15, %s1550_s15   ;;  %s1059_s14 = sphi %s1096_s14, %s1549_s14   ;;  %s1055_s13 = sphi %s1094_s13, %s1548_s13   ;;  %s1051_s12 = sphi %s1092_s12, %s1547_s12  }
   0x7   : > { %p40_p0 = scmp.ne.s32.totalorder %s1055_s13, %s1051_s12  ;;  %p1532_p1 = scmp.eq.s32.totalorder %s1113_s16, 0 }
   0x8   : > { %p112_p3 = scmp.eq.s32.totalorder %s679_s17, 3  ;;  %p680_p5 = scmp.ge.s32.totalorder %s1063_s15, 1 }
   0x9   : > { %p1122_p4 = por %p1532_p1, %p40_p0  ;;  %p119_p7 = scmp.lt.s32.totalorder %s1063_s15, 5 }
   0xa   : > { %p1127_p6 = por %p112_p3, %p40_p0  ;;  %s1065_s21 = smov [#allocation5]  }
   0xb   : > { %s1535_s18 = scalar_select %p1122_p4, 1, 0 }
   0xc   : > { %s1536_s19 = scalar_select %p1127_p6, 1, 0 }
   0xd   : > { %p1132_p8 = pnand %p680_p5, %p119_p7  ;;  %s131_s22 = sshll.u32 %s1065_s21, 4  ;;  %s132_s22 = int_to_ptr.vmem [resolvable:$true] %s131_s22 }
   0xe   : > { %s1145_s24 = sadd.s32 1, %s1063_s15   ;;  %s27_s25 = sadd.s32 1, %s1059_s14 }
   0xf   : > { %s1537_s20 = scalar_select %p1132_p8, 1, 0 }
  0x10   : > { %p882_p9 = pneg %p1132_p8  ;;  %s24_s26 = ssub.s32 %s1063_s15, %s1145_s24 }
  0x11   : > { %s935_s29 = scalar_lea.hbm %s1529_s1, 2048 }
  0x12   : > { %p1140_p10 = pnand %p882_p9, %p1532_p1  ;;  %p936_p11 = scmp.ne.s32.totalorder %s1529_s1, %s935_s29 }
  0x13   : > { %p942_p3 = scmp.lt.u32.totalorder %s935_s29, %s1529_s1 }
  0x14   : > { %p937_p12 = pneg %p1140_p10 }
  0x16   : > { %p938_p13 = pnand %p937_p12, %p936_p11 }
  0x18   : > { %p939_p0 = pneg %p938_p13 }
  0x1a   : > { %p944_p5 = pnand %p942_p3, %p939_p0 }
  0x1c   : > { %947 = shalt.err (!%p944_p5)
}
  0x1d   : > { %s948_s7 = scalar_lea.vmem %s132_s22, 2048  ;;  %p956_p2 = scmp.lt.s32.totalorder %s132_s22, %s132_s22 }
  0x1e   : > { %p949_p7 = scmp.ne.s32.totalorder %s132_s22, %s948_s7  ;;  %p957_p6 = scmp.lt.s32.totalorder %s948_s7, %s948_s7 }
  0x20   : > { %p951_p9 = pnand %p949_p7, %p937_p12  ;;  %p958_p4 = por %p957_p6, %p956_p2 }
  0x22   : > { %p952_p1 = pneg %p951_p9 }
  0x24   : > { %p959_p8 = pnand %p958_p4, %p952_p1 }
  0x26   : > { %962 = shalt.err (!%p959_p8)
}
  0x27   : > { %s1066_s8 = smov 128   ;;  %s1067_s9 = smov 8  }
  0x28   : > { %885 = dma.hbm_to_vmem [thread:$0]  (!%p1140_p10), %s1529_s1, 2048, %s132_s22, [#allocation6], %s1066_s8, %s1066_s8, %s1067_s9  }
  0x29   : > { %p25_p1 = scmp.eq.s32.totalorder %s24_s26, 0  ;;  %p34_p2 = scmp.ne.s32.totalorder %s1059_s14, %s1055_s13 }
  0x2a   : > { %p35_p4 = scmp.eq.s32.totalorder %s1063_s15, 0  ;;  %p895_p6 = scmp.lt.s32.totalorder %s1063_s15, 4 }
  0x2b   : > { %s1174_s17 = scalar_select %p25_p1, %s1059_s14, %s27_s25  }
  0x2c   : > { %p36_p8 = por %p35_p4, %p34_p2  ;;  %p1539_p11 = scmp.eq.s32.totalorder %s1113_s16, 3 }
  0x2d   : > { %s148_s23 = sand.u32 1, %s1059_s14   ;;  %s696_s27 = sshll.u32 %s1063_s15, 12 }
  0x2e   : > { %p1178_p12 = por %p1539_p11, %p34_p2  ;;  %s683_s28 = sshll.u32 %s148_s23, 8 }
  0x2f   : > { %s1187_s4 = scalar_lea.hbm %s1528_s0, %s696_s27  ;;  %s152_s22 = scalar_lea.vmem [#allocation2], %s683_s28 }
  0x30   : > { %s159_s25 = sshll.u32 %s152_s22, 4  ;;  %p1189_p10 = pnand %p895_p6, %p36_p8  ;;  %s1193_s25 = int_to_ptr.vmem [resolvable:$true] %s159_s25 }
  0x31   : > { %s1195_s5 = scalar_lea.sflag [#allocation3], %s148_s23  ;;  %s963_s6 = scalar_lea.hbm %s1187_s4, 4096 }
  0x32   : > { %p964_p13 = scmp.ne.s32.totalorder %s1187_s4, %s963_s6  ;;  %p965_p0 = pneg %p1189_p10 }
  0x33   : > { %s968_s11 = scalar_lea.hbm %s1528_s0, 16384  ;;  %p969_p7 = scmp.lt.u32.totalorder %s1187_s4, %s1528_s0 }
  0x34   : > { %p966_p3 = pnand %p965_p0, %p964_p13  ;;  %p970_p9 = scmp.lt.u32.totalorder %s968_s11, %s963_s6 }
  0x35   : > { %p972_p2 = scmp.lt.u32.totalorder %s963_s6, %s1187_s4 }
  0x36   : > { %p967_p5 = pneg %p966_p3  ;;  %p971_p1 = por %p970_p9, %p969_p7 }
  0x38   : > { %p973_p4 = por %p972_p2, %p971_p1 }
  0x3a   : > { %p974_p6 = pnand %p973_p4, %p967_p5 }
  0x3c   : > { %977 = shalt.err (!%p974_p6)
}
  0x3d   : > { %s978_s23 = scalar_lea.vmem %s1193_s25, 4096  ;;  %s1068_s29 = smov [#allocation2]  }
  0x3e   : > { %p979_p8 = scmp.ne.s32.totalorder %s1193_s25, %s978_s23  ;;  %s983_s30 = sshll.u32 %s1068_s29, 4  ;;  %s984_s30 = int_to_ptr.vmem [resolvable:$false] %s983_s30 }
  0x3f   : > { %s985_s22 = scalar_lea.vmem %s984_s30, 8192  ;;  %p986_p3 = scmp.lt.s32.totalorder %s1193_s25, %s984_s30 }
  0x40   : > { %p981_p11 = pnand %p979_p8, %p965_p0  ;;  %p987_p7 = scmp.lt.s32.totalorder %s985_s22, %s978_s23 }
  0x42   : > { %p982_p13 = pneg %p981_p11  ;;  %p988_p9 = por %p987_p7, %p986_p3 }
  0x44   : > { %p989_p1 = pnand %p988_p9, %p982_p13 }
  0x46   : > { %992 = shalt.err (!%p989_p1)
}
  0x47   : > { %889 = dma.hbm_to_vmem [thread:$0]  (!%p1189_p10), %s1187_s4, 4096, %s1193_s25, %s1195_s5, %s1066_s8, %s1066_s8, %s1067_s9  }
  0x48   : > { %p1542_p0 = scmp.ne.s32.totalorder %s1537_s20, 0 }
  0x49   : > { %s1229_s6 = sand.u32 (!%p1542_p0), 1, %s1055_s13   ;;  %p1543_p5 = scmp.ne.s32.totalorder (!%p1542_p0), %s1535_s18, 0 }
  0x4a   : > { %171 = sbr.rel (%p1542_p0) target bundleno = 380 (0x17c), region = 32  ;;  %s687_s7 = sshll.u32 (!%p1542_p0), %s1229_s6, 8 }
  0x4b   : > { %s174_s10 = scalar_lea.sflag (!%p1542_p0), [#allocation3], %s1229_s6  ;;  %s1235_s26 = scalar_lea.vmem (!%p1542_p0), [#allocation2], %s687_s7 }
  0x51   : > { %1038 = dma.done.wait (%p1543_p5), %s174_s10, 4096  }
  0x52   : > { %1040 = vsyncadd (%p1543_p5), %s174_s10, 4294963200  ;;  %p1544_p10 = scmp.eq.s32.totalorder %s1113_s16, 0 }
  0x54   : > { %1042 = dma.done.wait (%p1544_p10), [#allocation6], 2048   ;;  %p1545_p2 = pmov %p1544_p10 }
  0x55   : > { %v238_v0 = vld [vmem:[#allocation5] sm:$0xff]  ;;  %v239_v1 = vld [vmem:[#allocation5 + $0x8] sm:$0xff]  ;;  %v240_v2 = vld [vmem:[#allocation5 + $0x10] sm:$0xff]  ;;  %s1388_s8 = scalar_lea.vmem [#allocation7], %s687_s7  ;;  %s697_s9 = sshll.u32 %s1113_s16, 12 }
  0x56   : > { %1044 = vsyncadd (%p1545_p2), [#allocation6], 4294965248  ;;  %v826_v3 = vpack.c.bf16 %v239_v1, %v238_v0  ;;  %v241_v4 = vld [vmem:[#allocation5 + $0x18] sm:$0xff]  ;;  %v242_v6 = vld [vmem:[#allocation5 + $0x20] sm:$0xff]  ;;  %s596_s4 = sshll.u32 %s1388_s8, 4  ;;  %s1477_s5 = scalar_lea.hbm %s1531_s3, %s697_s9  ;;  %s1479_s4 = int_to_ptr.vmem [resolvable:$true] %s596_s4 }
  0x57   : > { %v830_v5 = vpack.c.bf16 %v241_v4, %v240_v2  ;;  %v243_v7 = vld [vmem:[#allocation5 + $0x28] sm:$0xff]  ;;  %v1246_v9 = vld [vmem:[%s1235_s26] sm:$0xff]  ;;  %v244_v11 = vld [vmem:[#allocation5 + $0x30] sm:$0xff]  ;;  %s583_s11 = scalar_lea.sflag [#allocation4], %s1229_s6  ;;  %s993_s27 = scalar_lea.vmem %s1479_s4, 4096 }
  0x58   : > { %827 = vmatprep.subr.bf16.mxu0 %v826_v3  ;;  %858 = vmatprep.subr.bf16.mxu1 %v826_v3  ;;  %v834_v8 = vpack.c.bf16 %v243_v7, %v242_v6  ;;  %v1249_v10 = vld [vmem:[%s1235_s26 + $0x80] sm:$0xff]  ;;  %v245_v12 = vld [vmem:[#allocation5 + $0x38] sm:$0xff]  ;;  %v247_v15 = vld [vmem:[#allocation5 + $0x48] sm:$0xff]  ;;  %p994_p4 = scmp.ne.s32.totalorder %s1479_s4, %s993_s27  ;;  %s1069_s28 = smov [#allocation7]  }
  0x59   : > { %829 = vmatpush3.bf16.msra.mxu0 %v826_v3  ;;  %866 = vmatpush3.bf16.msra.mxu1 %v826_v3  ;;  %v838_v13 = vpack.c.bf16 %v245_v12, %v244_v11  ;;  %v246_v14 = vld [vmem:[#allocation5 + $0x40] sm:$0xff]  ;;  %v248_v17 = vld [vmem:[#allocation5 + $0x50] sm:$0xff]  ;;  %v249_v18 = vld [vmem:[#allocation5 + $0x58] sm:$0xff]  ;;  %s997_s23 = sshll.u32 %s1069_s28, 4  ;;  %s998_s23 = int_to_ptr.vmem [resolvable:$false] %s997_s23 }
  0x5a   : > { %831 = vmatprep.subr.bf16.mxu0 %v830_v5  ;;  %859 = vmatprep.subr.bf16.mxu1 %v830_v5  ;;  %v842_v16 = vpack.c.bf16 %v247_v15, %v246_v14  ;;  %v846_v19 = vpack.c.bf16 %v249_v18, %v248_v17  ;;  %v250_v20 = vld [vmem:[#allocation5 + $0x60] sm:$0xff]  ;;  %v251_v21 = vld [vmem:[#allocation5 + $0x68] sm:$0xff]  ;;  %v252_v23 = vld [vmem:[#allocation5 + $0x70] sm:$0xff]  ;;  %p995_p6 = pnand %p994_p4, %p1178_p12  ;;  %s999_s29 = scalar_lea.vmem %s998_s23, 8192 }
  0x5b   : > { %778 = vmatprep.mubr.f32.mxu0 %v1246_v9  ;;  %802 = vmatprep.mubr.f32.mxu1 %v1249_v10  ;;  %v850_v22 = vpack.c.bf16 %v251_v21, %v250_v20  ;;  %v253_v24 = vld [vmem:[#allocation5 + $0x78] sm:$0xff]  ;;  %v1254_v26 = vld [vmem:[%s1235_s26 + $0x8] sm:$0xff]  ;;  %v1260_v28 = vld [vmem:[%s1235_s26 + $0x10] sm:$0xff]  ;;  %p1000_p11 = scmp.lt.s32.totalorder %s1479_s4, %s998_s23  ;;  %p1001_p13 = scmp.lt.s32.totalorder %s999_s29, %s993_s27 }
  0x5c   : > { %v854_v25 = vpack.c.bf16 %v253_v24, %v252_v23  ;;  %v1257_v27 = vld [vmem:[%s1235_s26 + $0x88] sm:$0xff]  ;;  %v1263_v29 = vld [vmem:[%s1235_s26 + $0x90] sm:$0xff]  ;;  %v1270_v30 = vld [vmem:[%s1235_s26 + $0x18] sm:$0xff]  ;;  %p996_p8 = pneg %p995_p6 }
  0x5d   : > { %833 = vmatpush3.bf16.msra.mxu0 %v830_v5  ;;  %867 = vmatpush3.bf16.msra.mxu1 %v830_v5  ;;  %v1273_v31 = vld [vmem:[%s1235_s26 + $0x98] sm:$0xff]  ;;  %v1276_v32 = vld [vmem:[%s1235_s26 + $0x20] sm:$0xff]  ;;  %v1286_v34 = vld [vmem:[%s1235_s26 + $0x28] sm:$0xff]  ;;  %p1002_p3 = por %p1001_p13, %p1000_p11 }
  0x5e   : > { %835 = vmatprep.subr.bf16.mxu0 %v834_v8  ;;  %860 = vmatprep.subr.bf16.mxu1 %v834_v8  ;;  %v1279_v33 = vld [vmem:[%s1235_s26 + $0xa0] sm:$0xff]  ;;  %v1289_v35 = vld [vmem:[%s1235_s26 + $0xa8] sm:$0xff]  ;;  %v1292_v36 = vld [vmem:[%s1235_s26 + $0x30] sm:$0xff] }
  0x5f   : > { %v1295_v37 = vld [vmem:[%s1235_s26 + $0xb0] sm:$0xff]  ;;  %v1302_v38 = vld [vmem:[%s1235_s26 + $0x38] sm:$0xff]  ;;  %v1308_v40 = vld [vmem:[%s1235_s26 + $0x40] sm:$0xff]  ;;  %p1003_p7 = pnand %p1002_p3, %p996_p8 }
  0x60   : > { %v1305_v39 = vld [vmem:[%s1235_s26 + $0xb8] sm:$0xff]  ;;  %v1311_v41 = vld [vmem:[%s1235_s26 + $0xc0] sm:$0xff]  ;;  %v1318_v42 = vld [vmem:[%s1235_s26 + $0x48] sm:$0xff] }
  0x61   : > { %837 = vmatpush3.bf16.msra.mxu0 %v834_v8  ;;  %868 = vmatpush3.bf16.msra.mxu1 %v834_v8  ;;  %v1321_v43 = vld [vmem:[%s1235_s26 + $0xc8] sm:$0xff]  ;;  %v1324_v44 = vld [vmem:[%s1235_s26 + $0x50] sm:$0xff]  ;;  %v1334_v46 = vld [vmem:[%s1235_s26 + $0x58] sm:$0xff] }
  0x62   : > { %839 = vmatprep.subr.bf16.mxu0 %v838_v13  ;;  %861 = vmatprep.subr.bf16.mxu1 %v838_v13  ;;  %v1327_v45 = vld [vmem:[%s1235_s26 + $0xd0] sm:$0xff]  ;;  %v1337_v47 = vld [vmem:[%s1235_s26 + $0xd8] sm:$0xff]  ;;  %v1340_v48 = vld [vmem:[%s1235_s26 + $0x60] sm:$0xff] }
  0x63   : > { %v1343_v49 = vld [vmem:[%s1235_s26 + $0xe0] sm:$0xff]  ;;  %v1350_v50 = vld [vmem:[%s1235_s26 + $0x68] sm:$0xff]  ;;  %v1356_v52 = vld [vmem:[%s1235_s26 + $0x70] sm:$0xff] }
  0x64   : > { %v1353_v51 = vld [vmem:[%s1235_s26 + $0xe8] sm:$0xff]  ;;  %v1359_v53 = vld [vmem:[%s1235_s26 + $0xf0] sm:$0xff]  ;;  %v1366_v54 = vld [vmem:[%s1235_s26 + $0x78] sm:$0xff] }
  0x65   : > { %841 = vmatpush3.bf16.msra.mxu0 %v838_v13  ;;  %869 = vmatpush3.bf16.msra.mxu1 %v838_v13  ;;  %v1369_v55 = vld [vmem:[%s1235_s26 + $0xf8] sm:$0xff]  ;;  %v1376_v57 = vld [vmem:[%s1530_s2] ss:$0 sm:$0xff] }
  0x66   : > { %843 = vmatprep.subr.bf16.mxu0 %v842_v16  ;;  %862 = vmatprep.subr.bf16.mxu1 %v842_v16 }
  0x69   : > { %845 = vmatpush3.bf16.msra.mxu0 %v842_v16  ;;  %870 = vmatpush3.bf16.msra.mxu1 %v842_v16 }
  0x6a   : > { %847 = vmatprep.subr.bf16.mxu0 %v846_v19  ;;  %863 = vmatprep.subr.bf16.mxu1 %v846_v19 }
  0x6d   : > { %849 = vmatpush3.bf16.msra.mxu0 %v846_v19  ;;  %871 = vmatpush3.bf16.msra.mxu1 %v846_v19 }
  0x6e   : > { %851 = vmatprep.subr.bf16.mxu0 %v850_v22  ;;  %864 = vmatprep.subr.bf16.mxu1 %v850_v22 }
  0x71   : > { %853 = vmatpush3.bf16.msra.mxu0 %v850_v22  ;;  %872 = vmatpush3.bf16.msra.mxu1 %v850_v22 }
  0x72   : > { %855 = vmatprep.subr.bf16.mxu0 %v854_v25  ;;  %865 = vmatprep.subr.bf16.mxu1 %v854_v25 }
  0x75   : > { %857 = vmatpush3.bf16.msra.mxu0 %v854_v25  ;;  %873 = vmatpush3.bf16.msra.mxu1 %v854_v25 }
  0x78   : > { %779 = vmatmul.mubr.f32.vlgmr.msra.gmra.mrb[0].mxu0 %v1254_v26  ;;  %803 = vmatmul.mubr.f32.vlgmr.msra.gmra.mrb[0].mxu1 %v1257_v27 }
  0x79   : > { %781 = vmatprep.mubr.f32.mxu0 %v1260_v28  ;;  %805 = vmatprep.mubr.f32.mxu1 %v1263_v29 }
  0x7c   : > { %782 = vmatmul.mubr.f32.gmra.mrb[2].mxu0 %v1270_v30  ;;  %806 = vmatmul.mubr.f32.gmra.mrb[2].mxu1 %v1273_v31 }
  0x7d   : > { %784 = vmatprep.mubr.f32.mxu0 %v1276_v32  ;;  %808 = vmatprep.mubr.f32.mxu1 %v1279_v33 }
  0x80   : > { %785 = vmatmul.mubr.f32.gmra.mrb[4].mxu0 %v1286_v34  ;;  %809 = vmatmul.mubr.f32.gmra.mrb[4].mxu1 %v1289_v35 }
  0x81   : > { %787 = vmatprep.mubr.f32.mxu0 %v1292_v36  ;;  %811 = vmatprep.mubr.f32.mxu1 %v1295_v37 }
  0x84   : > { %788 = vmatmul.mubr.f32.gmra.mrb[6].mxu0 %v1302_v38  ;;  %812 = vmatmul.mubr.f32.gmra.mrb[6].mxu1 %v1305_v39 }
  0x85   : > { %790 = vmatprep.mubr.f32.mxu0 %v1308_v40  ;;  %814 = vmatprep.mubr.f32.mxu1 %v1311_v41 }
  0x88   : > { %791 = vmatmul.mubr.f32.gmra.mrb[8].mxu0 %v1318_v42  ;;  %815 = vmatmul.mubr.f32.gmra.mrb[8].mxu1 %v1321_v43 }
  0x89   : > { %793 = vmatprep.mubr.f32.mxu0 %v1324_v44  ;;  %817 = vmatprep.mubr.f32.mxu1 %v1327_v45 }
  0x8c   : > { %794 = vmatmul.mubr.f32.gmra.mrb[10].mxu0 %v1334_v46  ;;  %818 = vmatmul.mubr.f32.gmra.mrb[10].mxu1 %v1337_v47 }
  0x8d   : > { %796 = vmatprep.mubr.f32.mxu0 %v1340_v48  ;;  %820 = vmatprep.mubr.f32.mxu1 %v1343_v49 }
  0x90   : > { %797 = vmatmul.mubr.f32.gmra.mrb[12].mxu0 %v1350_v50  ;;  %821 = vmatmul.mubr.f32.gmra.mrb[12].mxu1 %v1353_v51 }
  0x91   : > { %799 = vmatprep.mubr.f32.mxu0 %v1356_v52  ;;  %823 = vmatprep.mubr.f32.mxu1 %v1359_v53 }
  0x94   : > { %800 = vmatmul.mubr.f32.gmra.mrb[14].mxu0 %v1366_v54  ;;  %824 = vmatmul.mubr.f32.gmra.mrb[14].mxu1 %v1369_v55 }
 0x14b   : > { %v780_v56 = vpop.f32.mrb[0].mxu0  ;;  %v804_v58 = vpop.f32.mrb[0].mxu1 }
 0x14c   : > { %v480_v59 = vadd.f32 %v780_v56, %v1254_v26  ;;  %v496_v60 = vadd.f32 %v804_v58, %v1257_v27  ;;  %v320_v61 = vpop.f32.mrb[1].mxu0  ;;  %v400_v62 = vpop.f32.mrb[1].mxu1 }
 0x14d   : > { %v479_v63 = vadd.f32 %v320_v61, %v1246_v9  ;;  %v495_v0 = vadd.f32 %v400_v62, %v1249_v10 }
 0x14e   : > { %v519_v1 = vadd.f32 %v1376_v57, %v480_v59  ;;  %v535_v2 = vadd.f32 %v1376_v57, %v496_v60 }
 0x14f   : > { %v518_v3 = vadd.f32 %v1376_v57, %v479_v63  ;;  %v534_v4 = vadd.f32 %v1376_v57, %v495_v0  ;;  %v783_v5 = vpop.f32.mrb[2].mxu0  ;;  %v807_v6 = vpop.f32.mrb[2].mxu1 }
 0x150   : > { %551 = vst [vmem:[%s1388_s8 + $0x8] sm:$0xff] %v519_v1  ;;  %567 = vst [vmem:[%s1388_s8 + $0x88] sm:$0xff] %v535_v2  ;;  %v482_v7 = vadd.f32 %v783_v5, %v1270_v30  ;;  %v498_v8 = vadd.f32 %v807_v6, %v1273_v31  ;;  %v330_v9 = vpop.f32.mrb[3].mxu0  ;;  %v410_v10 = vpop.f32.mrb[3].mxu1 }
 0x151   : > { %550 = vst [vmem:[%s1388_s8] sm:$0xff] %v518_v3  ;;  %566 = vst [vmem:[%s1388_s8 + $0x80] sm:$0xff] %v534_v4  ;;  %v481_v11 = vadd.f32 %v330_v9, %v1260_v28  ;;  %v497_v12 = vadd.f32 %v410_v10, %v1263_v29 }
 0x152   : > { %v521_v13 = vadd.f32 %v1376_v57, %v482_v7  ;;  %v537_v14 = vadd.f32 %v1376_v57, %v498_v8 }
 0x153   : > { %v520_v15 = vadd.f32 %v1376_v57, %v481_v11  ;;  %v536_v16 = vadd.f32 %v1376_v57, %v497_v12  ;;  %v786_v17 = vpop.f32.mrb[4].mxu0  ;;  %v810_v18 = vpop.f32.mrb[4].mxu1 }
 0x154   : > { %553 = vst [vmem:[%s1388_s8 + $0x18] sm:$0xff] %v521_v13  ;;  %569 = vst [vmem:[%s1388_s8 + $0x98] sm:$0xff] %v537_v14  ;;  %v484_v19 = vadd.f32 %v786_v17, %v1286_v34  ;;  %v500_v20 = vadd.f32 %v810_v18, %v1289_v35  ;;  %v340_v21 = vpop.f32.mrb[5].mxu0  ;;  %v420_v22 = vpop.f32.mrb[5].mxu1 }
 0x155   : > { %552 = vst [vmem:[%s1388_s8 + $0x10] sm:$0xff] %v520_v15  ;;  %568 = vst [vmem:[%s1388_s8 + $0x90] sm:$0xff] %v536_v16  ;;  %v483_v23 = vadd.f32 %v340_v21, %v1276_v32  ;;  %v499_v24 = vadd.f32 %v420_v22, %v1279_v33 }
 0x156   : > { %v523_v25 = vadd.f32 %v1376_v57, %v484_v19  ;;  %v539_v26 = vadd.f32 %v1376_v57, %v500_v20 }
 0x157   : > { %v522_v27 = vadd.f32 %v1376_v57, %v483_v23  ;;  %v538_v28 = vadd.f32 %v1376_v57, %v499_v24  ;;  %v789_v29 = vpop.f32.mrb[6].mxu0  ;;  %v813_v30 = vpop.f32.mrb[6].mxu1 }
 0x158   : > { %555 = vst [vmem:[%s1388_s8 + $0x28] sm:$0xff] %v523_v25  ;;  %571 = vst [vmem:[%s1388_s8 + $0xa8] sm:$0xff] %v539_v26  ;;  %v486_v31 = vadd.f32 %v789_v29, %v1302_v38  ;;  %v502_v32 = vadd.f32 %v813_v30, %v1305_v39  ;;  %v350_v34 = vpop.f32.mrb[7].mxu0  ;;  %v430_v33 = vpop.f32.mrb[7].mxu1 }
 0x159   : > { %554 = vst [vmem:[%s1388_s8 + $0x20] sm:$0xff] %v522_v27  ;;  %570 = vst [vmem:[%s1388_s8 + $0xa0] sm:$0xff] %v538_v28  ;;  %v485_v35 = vadd.f32 %v350_v34, %v1292_v36  ;;  %v501_v56 = vadd.f32 %v430_v33, %v1295_v37 }
 0x15a   : > { %v525_v58 = vadd.f32 %v1376_v57, %v486_v31  ;;  %v541_v59 = vadd.f32 %v1376_v57, %v502_v32 }
 0x15b   : > { %v524_v60 = vadd.f32 %v1376_v57, %v485_v35  ;;  %v540_v38 = vadd.f32 %v1376_v57, %v501_v56  ;;  %v792_v61 = vpop.f32.mrb[8].mxu0  ;;  %v816_v39 = vpop.f32.mrb[8].mxu1 }
 0x15c   : > { %557 = vst [vmem:[%s1388_s8 + $0x38] sm:$0xff] %v525_v58  ;;  %573 = vst [vmem:[%s1388_s8 + $0xb8] sm:$0xff] %v541_v59  ;;  %v488_v62 = vadd.f32 %v792_v61, %v1318_v42  ;;  %v504_v36 = vadd.f32 %v816_v39, %v1321_v43  ;;  %v360_v63 = vpop.f32.mrb[9].mxu0  ;;  %v440_v37 = vpop.f32.mrb[9].mxu1 }
 0x15d   : > { %556 = vst [vmem:[%s1388_s8 + $0x30] sm:$0xff] %v524_v60  ;;  %572 = vst [vmem:[%s1388_s8 + $0xb0] sm:$0xff] %v540_v38  ;;  %v487_v0 = vadd.f32 %v360_v63, %v1308_v40  ;;  %v503_v1 = vadd.f32 %v440_v37, %v1311_v41 }
 0x15e   : > { %v527_v2 = vadd.f32 %v1376_v57, %v488_v62  ;;  %v543_v3 = vadd.f32 %v1376_v57, %v504_v36 }
 0x15f   : > { %v526_v4 = vadd.f32 %v1376_v57, %v487_v0  ;;  %v542_v42 = vadd.f32 %v1376_v57, %v503_v1  ;;  %v795_v5 = vpop.f32.mrb[10].mxu0  ;;  %v819_v43 = vpop.f32.mrb[10].mxu1 }
 0x160   : > { %559 = vst [vmem:[%s1388_s8 + $0x48] sm:$0xff] %v527_v2  ;;  %575 = vst [vmem:[%s1388_s8 + $0xc8] sm:$0xff] %v543_v3  ;;  %v490_v6 = vadd.f32 %v795_v5, %v1334_v46  ;;  %v506_v40 = vadd.f32 %v819_v43, %v1337_v47  ;;  %v370_v7 = vpop.f32.mrb[11].mxu0  ;;  %v450_v41 = vpop.f32.mrb[11].mxu1 }
 0x161   : > { %558 = vst [vmem:[%s1388_s8 + $0x40] sm:$0xff] %v526_v4  ;;  %574 = vst [vmem:[%s1388_s8 + $0xc0] sm:$0xff] %v542_v42  ;;  %v489_v8 = vadd.f32 %v370_v7, %v1324_v44  ;;  %v505_v9 = vadd.f32 %v450_v41, %v1327_v45 }
 0x162   : > { %v529_v10 = vadd.f32 %v1376_v57, %v490_v6  ;;  %v545_v11 = vadd.f32 %v1376_v57, %v506_v40 }
 0x163   : > { %v528_v12 = vadd.f32 %v1376_v57, %v489_v8  ;;  %v544_v46 = vadd.f32 %v1376_v57, %v505_v9  ;;  %v798_v13 = vpop.f32.mrb[12].mxu0  ;;  %v822_v47 = vpop.f32.mrb[12].mxu1 }
 0x164   : > { %561 = vst [vmem:[%s1388_s8 + $0x58] sm:$0xff] %v529_v10  ;;  %577 = vst [vmem:[%s1388_s8 + $0xd8] sm:$0xff] %v545_v11  ;;  %v492_v14 = vadd.f32 %v798_v13, %v1350_v50  ;;  %v508_v44 = vadd.f32 %v822_v47, %v1353_v51  ;;  %v380_v45 = vpop.f32.mrb[13].mxu0  ;;  %v460_v15 = vpop.f32.mrb[13].mxu1 }
 0x165   : > { %560 = vst [vmem:[%s1388_s8 + $0x50] sm:$0xff] %v528_v12  ;;  %576 = vst [vmem:[%s1388_s8 + $0xd0] sm:$0xff] %v544_v46  ;;  %v491_v16 = vadd.f32 %v380_v45, %v1340_v48  ;;  %v507_v17 = vadd.f32 %v460_v15, %v1343_v49 }
 0x166   : > { %v531_v18 = vadd.f32 %v1376_v57, %v492_v14  ;;  %v547_v19 = vadd.f32 %v1376_v57, %v508_v44 }
 0x167   : > { %v530_v50 = vadd.f32 %v1376_v57, %v491_v16  ;;  %v546_v20 = vadd.f32 %v1376_v57, %v507_v17  ;;  %v801_v51 = vpop.f32.mrb[14].mxu0  ;;  %v825_v21 = vpop.f32.mrb[14].mxu1 }
 0x168   : > { %563 = vst [vmem:[%s1388_s8 + $0x68] sm:$0xff] %v531_v18  ;;  %579 = vst [vmem:[%s1388_s8 + $0xe8] sm:$0xff] %v547_v19  ;;  %v494_v48 = vadd.f32 %v801_v51, %v1366_v54  ;;  %v510_v49 = vadd.f32 %v825_v21, %v1369_v55  ;;  %v390_v22 = vpop.f32.mrb[15].mxu0  ;;  %v470_v23 = vpop.f32.mrb[15].mxu1 }
 0x169   : > { %562 = vst [vmem:[%s1388_s8 + $0x60] sm:$0xff] %v530_v50  ;;  %578 = vst [vmem:[%s1388_s8 + $0xe0] sm:$0xff] %v546_v20  ;;  %v493_v24 = vadd.f32 %v390_v22, %v1356_v52  ;;  %v509_v25 = vadd.f32 %v470_v23, %v1359_v53 }
 0x16a   : > { %v533_v26 = vadd.f32 %v1376_v57, %v494_v48  ;;  %v549_v27 = vadd.f32 %v1376_v57, %v510_v49 }
 0x16b   : > { %v532_v54 = vadd.f32 %v1376_v57, %v493_v24  ;;  %v548_v52 = vadd.f32 %v1376_v57, %v509_v25 }
 0x16c   : > { %565 = vst [vmem:[%s1388_s8 + $0x78] sm:$0xff] %v533_v26  ;;  %581 = vst [vmem:[%s1388_s8 + $0xf8] sm:$0xff] %v549_v27 }
 0x16d   : > { %564 = vst [vmem:[%s1388_s8 + $0x70] sm:$0xff] %v532_v54  ;;  %580 = vst [vmem:[%s1388_s8 + $0xf0] sm:$0xff] %v548_v52 }
 0x16e   : > { %1006 = shalt.err (!%p1003_p7)
}
 0x16f   : > { %s1007_s30 = scalar_lea.hbm %s1477_s5, 4096  ;;  %s1011_s10 = scalar_lea.hbm %s1531_s3, 16384 }
 0x170   : > { %p1008_p9 = scmp.ne.s32.totalorder %s1477_s5, %s1007_s30  ;;  %p1012_p5 = scmp.lt.u32.totalorder %s1477_s5, %s1531_s3 }
 0x171   : > { %p1013_p10 = scmp.lt.u32.totalorder %s1011_s10, %s1007_s30  ;;  %p1015_p4 = scmp.lt.u32.totalorder %s1007_s30, %s1477_s5 }
 0x172   : > { %p1009_p1 = pnand %p1008_p9, %p1178_p12 }
 0x173   : > { %p1014_p2 = por %p1013_p10, %p1012_p5 }
 0x174   : > { %p1010_p0 = pneg %p1009_p1 }
 0x175   : > { %p1016_p6 = por %p1015_p4, %p1014_p2 }
 0x177   : > { %p1017_p8 = pnand %p1016_p6, %p1010_p0 }
 0x179   : > { %1020 = shalt.err (!%p1017_p8)
}
 0x17a   : > { %s1070_s20 = smov 128   ;;  %s1071_s8 = smov 8  }
 0x17b   : > { %880 = dma.vmem_to_hbm [thread:$0]  (%p1178_p12), %s1479_s4, 4096, %s1477_s5, %s583_s11, %s1070_s20, %s1070_s20, %s1071_s8  }
 0x17c PF: > { %p897_p11 = scmp.ge.s32.totalorder %s1063_s15, 2  ;;  %s611_s9 = sand.u32 1, %s1051_s12  }
 0x17d   : > { %p1546_p13 = scmp.ne.s32.totalorder %s1536_s19, 0  ;;  %s612_s16 = scalar_lea.sflag [#allocation4], %s611_s9 }
 0x17f   : > { %p891_p3 = pnand %p897_p11, %p1546_p13 }
 0x181   : > { %1046 = dma.done.wait (!%p891_p3), %s612_s16, 4096  }
 0x182   : > { %1048 = vsyncadd (!%p891_p3), %s612_s16, 4294963200  ;;  %p17_p7 = scmp.ge.s32.totalorder %s1145_s24, 6   ;;  %s1547_s12 = smov %s1055_s13 }
 0x183   : > { %s1548_s13 = smov %s1059_s14  ;;  %s1549_s14 = smov %s1174_s17 }
 0x184   : > { %s1550_s15 = smov %s1145_s24  ;;  %19 = sbr.rel (!%p17_p7) target bundleno = 6 (0x6), region = 81 }
 0x18b   :  { %617 = vsyncpa [#allocation3], 1 }
 0x18c   :  { %619 = vsyncpa [#allocation3 + $0x1], 1 }
 0x18d   :  { %620 = vsyncpa [#allocation6], 1 }
 0x18e   :  { %621 = vsyncpa [#allocation4], 1 }
 0x18f   :  { %623 = vsyncpa [#allocation4 + $0x1], 1 }

// kernel: tpu_custom_call.1
= control target key start
LH: loop header
LB: loop body
LE: loop exit
PB: predicated region body
PF: predicated region fallthrough
CT: control target
= control target key end

     0   :  { %8 = vsyncpa [#allocation3], 0  ;;  %s1528_s0 = inlined_call_operand.hbm [shape: f32[1024,128], index: 0, kind: input, shape index: {}]   ;;  %s1529_s1 = inlined_call_operand.hbm [shape: f32[128,128], index: 1, kind: input, shape index: {}]   ;;  %s1530_s2 = inlined_call_operand.vmem [shape: f32[1,128], index: 2, kind: input, shape index: {}]   ;;  %s1531_s3 = inlined_call_operand.hbm [shape: f32[1024,128], index: 3, kind: output, shape index: {}]  }
   0x1   :  { %10 = vsyncpa [#allocation3 + $0x1], 0 }
   0x2   :  { %11 = vsyncpa [#allocation6], 0 }
   0x3   :  { %12 = vsyncpa [#allocation4], 0 }
   0x4   :  { %14 = vsyncpa [#allocation4 + $0x1], 0  ;;  %s1092_s12 = smov 0   ;;  %s1094_s13 = smov 0  }
   0x5   :  { %s1096_s14 = smov 0   ;;  %s1098_s15 = smov 0  }
   0x6 LB: > { %s1113_s16 = sadd.s32 4294967295, %s1063_s15   ;;  %s679_s17 = sadd.s32 4294967294, %s1063_s15   ;;  %s1063_s15 = sphi %s1098_s15, %s1550_s15   ;;  %s1059_s14 = sphi %s1096_s14, %s1549_s14   ;;  %s1055_s13 = sphi %s1094_s13, %s1548_s13   ;;  %s1051_s12 = sphi %s1092_s12, %s1547_s12  }
   0x7   : > { %p40_p0 = scmp.ne.s32.totalorder %s1055_s13, %s1051_s12  ;;  %p1532_p1 = scmp.eq.s32.totalorder %s1113_s16, 0 }
   0x8   : > { %p112_p3 = scmp.eq.s32.totalorder %s679_s17, 3  ;;  %p680_p5 = scmp.ge.s32.totalorder %s1063_s15, 1 }
   0x9   : > { %p1122_p4 = por %p1532_p1, %p40_p0  ;;  %p119_p7 = scmp.lt.s32.totalorder %s1063_s15, 5 }
   0xa   : > { %p1127_p6 = por %p112_p3, %p40_p0  ;;  %s1065_s21 = smov [#allocation5]  }
   0xb   : > { %s1535_s18 = scalar_select %p1122_p4, 1, 0 }
   0xc   : > { %s1536_s19 = scalar_select %p1127_p6, 1, 0 }
   0xd   : > { %p1132_p8 = pnand %p680_p5, %p119_p7  ;;  %s131_s22 = sshll.u32 %s1065_s21, 4  ;;  %s132_s22 = int_to_ptr.vmem [resolvable:$true] %s131_s22 }
   0xe   : > { %s1145_s24 = sadd.s32 1, %s1063_s15   ;;  %s27_s25 = sadd.s32 1, %s1059_s14 }
   0xf   : > { %s1537_s20 = scalar_select %p1132_p8, 1, 0 }
  0x10   : > { %p882_p9 = pneg %p1132_p8  ;;  %s24_s26 = ssub.s32 %s1063_s15, %s1145_s24 }
  0x11   : > { %s935_s29 = scalar_lea.hbm %s1529_s1, 2048 }
  0x12   : > { %p1140_p10 = pnand %p882_p9, %p1532_p1  ;;  %p936_p11 = scmp.ne.s32.totalorder %s1529_s1, %s935_s29 }
  0x13   : > { %p942_p3 = scmp.lt.u32.totalorder %s935_s29, %s1529_s1 }
  0x14   : > { %p937_p12 = pneg %p1140_p10 }
  0x16   : > { %p938_p13 = pnand %p937_p12, %p936_p11 }
  0x18   : > { %p939_p0 = pneg %p938_p13 }
  0x1a   : > { %p944_p5 = pnand %p942_p3, %p939_p0 }
  0x1c   : > { %947 = shalt.err (!%p944_p5)
}
  0x1d   : > { %s948_s7 = scalar_lea.vmem %s132_s22, 2048  ;;  %p956_p2 = scmp.lt.s32.totalorder %s132_s22, %s132_s22 }
  0x1e   : > { %p949_p7 = scmp.ne.s32.totalorder %s132_s22, %s948_s7  ;;  %p957_p6 = scmp.lt.s32.totalorder %s948_s7, %s948_s7 }
  0x20   : > { %p951_p9 = pnand %p949_p7, %p937_p12  ;;  %p958_p4 = por %p957_p6, %p956_p2 }
  0x22   : > { %p952_p1 = pneg %p951_p9 }
  0x24   : > { %p959_p8 = pnand %p958_p4, %p952_p1 }
  0x26   : > { %962 = shalt.err (!%p959_p8)
}
  0x27   : > { %s1066_s8 = smov 128   ;;  %s1067_s9 = smov 8  }
  0x28   : > { %885 = dma.hbm_to_vmem [thread:$0]  (!%p1140_p10), %s1529_s1, 2048, %s132_s22, [#allocation6], %s1066_s8, %s1066_s8, %s1067_s9  }
  0x29   : > { %p25_p1 = scmp.eq.s32.totalorder %s24_s26, 0  ;;  %p34_p2 = scmp.ne.s32.totalorder %s1059_s14, %s1055_s13 }
  0x2a   : > { %p35_p4 = scmp.eq.s32.totalorder %s1063_s15, 0  ;;  %p895_p6 = scmp.lt.s32.totalorder %s1063_s15, 4 }
  0x2b   : > { %s1174_s17 = scalar_select %p25_p1, %s1059_s14, %s27_s25  }
  0x2c   : > { %p36_p8 = por %p35_p4, %p34_p2  ;;  %p1539_p11 = scmp.eq.s32.totalorder %s1113_s16, 3 }
  0x2d   : > { %s148_s23 = sand.u32 1, %s1059_s14   ;;  %s696_s27 = sshll.u32 %s1063_s15, 12 }
  0x2e   : > { %p1178_p12 = por %p1539_p11, %p34_p2  ;;  %s683_s28 = sshll.u32 %s148_s23, 8 }
  0x2f   : > { %s1187_s4 = scalar_lea.hbm %s1528_s0, %s696_s27  ;;  %s152_s22 = scalar_lea.vmem [#allocation2], %s683_s28 }
  0x30   : > { %s159_s25 = sshll.u32 %s152_s22, 4  ;;  %p1189_p10 = pnand %p895_p6, %p36_p8  ;;  %s1193_s25 = int_to_ptr.vmem [resolvable:$true] %s159_s25 }
  0x31   : > { %s1195_s5 = scalar_lea.sflag [#allocation3], %s148_s23  ;;  %s963_s6 = scalar_lea.hbm %s1187_s4, 4096 }
  0x32   : > { %p964_p13 = scmp.ne.s32.totalorder %s1187_s4, %s963_s6  ;;  %p965_p0 = pneg %p1189_p10 }
  0x33   : > { %s968_s11 = scalar_lea.hbm %s1528_s0, 16384  ;;  %p969_p7 = scmp.lt.u32.totalorder %s1187_s4, %s1528_s0 }
  0x34   : > { %p966_p3 = pnand %p965_p0, %p964_p13  ;;  %p970_p9 = scmp.lt.u32.totalorder %s968_s11, %s963_s6 }
  0x35   : > { %p972_p2 = scmp.lt.u32.totalorder %s963_s6, %s1187_s4 }
  0x36   : > { %p967_p5 = pneg %p966_p3  ;;  %p971_p1 = por %p970_p9, %p969_p7 }
  0x38   : > { %p973_p4 = por %p972_p2, %p971_p1 }
  0x3a   : > { %p974_p6 = pnand %p973_p4, %p967_p5 }
  0x3c   : > { %977 = shalt.err (!%p974_p6)
}
  0x3d   : > { %s978_s23 = scalar_lea.vmem %s1193_s25, 4096  ;;  %s1068_s29 = smov [#allocation2]  }
  0x3e   : > { %p979_p8 = scmp.ne.s32.totalorder %s1193_s25, %s978_s23  ;;  %s983_s30 = sshll.u32 %s1068_s29, 4  ;;  %s984_s30 = int_to_ptr.vmem [resolvable:$false] %s983_s30 }
  0x3f   : > { %s985_s22 = scalar_lea.vmem %s984_s30, 8192  ;;  %p986_p3 = scmp.lt.s32.totalorder %s1193_s25, %s984_s30 }
  0x40   : > { %p981_p11 = pnand %p979_p8, %p965_p0  ;;  %p987_p7 = scmp.lt.s32.totalorder %s985_s22, %s978_s23 }
  0x42   : > { %p982_p13 = pneg %p981_p11  ;;  %p988_p9 = por %p987_p7, %p986_p3 }
  0x44   : > { %p989_p1 = pnand %p988_p9, %p982_p13 }
  0x46   : > { %992 = shalt.err (!%p989_p1)
}
  0x47   : > { %889 = dma.hbm_to_vmem [thread:$0]  (!%p1189_p10), %s1187_s4, 4096, %s1193_s25, %s1195_s5, %s1066_s8, %s1066_s8, %s1067_s9  }
  0x48   : > { %p1542_p0 = scmp.ne.s32.totalorder %s1537_s20, 0 }
  0x49   : > { %s1229_s6 = sand.u32 (!%p1542_p0), 1, %s1055_s13   ;;  %p1543_p5 = scmp.ne.s32.totalorder (!%p1542_p0), %s1535_s18, 0 }
  0x4a   : > { %171 = sbr.rel (%p1542_p0) target bundleno = 380 (0x17c), region = 32  ;;  %s687_s7 = sshll.u32 (!%p1542_p0), %s1229_s6, 8 }
  0x4b   : > { %s174_s10 = scalar_lea.sflag (!%p1542_p0), [#allocation3], %s1229_s6  ;;  %s1235_s26 = scalar_lea.vmem (!%p1542_p0), [#allocation2], %s687_s7 }
  0x51   : > { %1038 = dma.done.wait (%p1543_p5), %s174_s10, 4096  }
  0x52   : > { %1040 = vsyncadd (%p1543_p5), %s174_s10, 4294963200  ;;  %p1544_p10 = scmp.eq.s32.totalorder %s1113_s16, 0 }
  0x54   : > { %1042 = dma.done.wait (%p1544_p10), [#allocation6], 2048   ;;  %p1545_p2 = pmov %p1544_p10 }
  0x55   : > { %v238_v0 = vld [vmem:[#allocation5] sm:$0xff]  ;;  %v239_v1 = vld [vmem:[#allocation5 + $0x8] sm:$0xff]  ;;  %v240_v2 = vld [vmem:[#allocation5 + $0x10] sm:$0xff]  ;;  %s1388_s8 = scalar_lea.vmem [#allocation7], %s687_s7  ;;  %s697_s9 = sshll.u32 %s1113_s16, 12 }
  0x56   : > { %1044 = vsyncadd (%p1545_p2), [#allocation6], 4294965248  ;;  %v826_v3 = vpack.c.bf16 %v239_v1, %v238_v0  ;;  %v241_v4 = vld [vmem:[#allocation5 + $0x18] sm:$0xff]  ;;  %v242_v6 = vld [vmem:[#allocation5 + $0x20] sm:$0xff]  ;;  %s596_s4 = sshll.u32 %s1388_s8, 4  ;;  %s1477_s5 = scalar_lea.hbm %s1531_s3, %s697_s9  ;;  %s1479_s4 = int_to_ptr.vmem [resolvable:$true] %s596_s4 }
  0x57   : > { %v830_v5 = vpack.c.bf16 %v241_v4, %v240_v2  ;;  %v243_v7 = vld [vmem:[#allocation5 + $0x28] sm:$0xff]  ;;  %v1246_v9 = vld [vmem:[%s1235_s26] sm:$0xff]  ;;  %v244_v11 = vld [vmem:[#allocation5 + $0x30] sm:$0xff]  ;;  %s583_s11 = scalar_lea.sflag [#allocation4], %s1229_s6  ;;  %s993_s27 = scalar_lea.vmem %s1479_s4, 4096 }
  0x58   : > { %827 = vmatprep.subr.bf16.mxu0 %v826_v3  ;;  %858 = vmatprep.subr.bf16.mxu1 %v826_v3  ;;  %v834_v8 = vpack.c.bf16 %v243_v7, %v242_v6  ;;  %v1249_v10 = vld [vmem:[%s1235_s26 + $0x80] sm:$0xff]  ;;  %v245_v12 = vld [vmem:[#allocation5 + $0x38] sm:$0xff]  ;;  %v247_v15 = vld [vmem:[#allocation5 + $0x48] sm:$0xff]  ;;  %p994_p4 = scmp.ne.s32.totalorder %s1479_s4, %s993_s27  ;;  %s1069_s28 = smov [#allocation7]  }
  0x59   : > { %829 = vmatpush3.bf16.msra.mxu0 %v826_v3  ;;  %866 = vmatpush3.bf16.msra.mxu1 %v826_v3  ;;  %v838_v13 = vpack.c.bf16 %v245_v12, %v244_v11  ;;  %v246_v14 = vld [vmem:[#allocation5 + $0x40] sm:$0xff]  ;;  %v248_v17 = vld [vmem:[#allocation5 + $0x50] sm:$0xff]  ;;  %v249_v18 = vld [vmem:[#allocation5 + $0x58] sm:$0xff]  ;;  %s997_s23 = sshll.u32 %s1069_s28, 4  ;;  %s998_s23 = int_to_ptr.vmem [resolvable:$false] %s997_s23 }
  0x5a   : > { %831 = vmatprep.subr.bf16.mxu0 %v830_v5  ;;  %859 = vmatprep.subr.bf16.mxu1 %v830_v5  ;;  %v842_v16 = vpack.c.bf16 %v247_v15, %v246_v14  ;;  %v846_v19 = vpack.c.bf16 %v249_v18, %v248_v17  ;;  %v250_v20 = vld [vmem:[#allocation5 + $0x60] sm:$0xff]  ;;  %v251_v21 = vld [vmem:[#allocation5 + $0x68] sm:$0xff]  ;;  %v252_v23 = vld [vmem:[#allocation5 + $0x70] sm:$0xff]  ;;  %p995_p6 = pnand %p994_p4, %p1178_p12  ;;  %s999_s29 = scalar_lea.vmem %s998_s23, 8192 }
  0x5b   : > { %778 = vmatprep.mubr.f32.mxu0 %v1246_v9  ;;  %802 = vmatprep.mubr.f32.mxu1 %v1249_v10  ;;  %v850_v22 = vpack.c.bf16 %v251_v21, %v250_v20  ;;  %v253_v24 = vld [vmem:[#allocation5 + $0x78] sm:$0xff]  ;;  %v1254_v26 = vld [vmem:[%s1235_s26 + $0x8] sm:$0xff]  ;;  %v1260_v28 = vld [vmem:[%s1235_s26 + $0x10] sm:$0xff]  ;;  %p1000_p11 = scmp.lt.s32.totalorder %s1479_s4, %s998_s23  ;;  %p1001_p13 = scmp.lt.s32.totalorder %s999_s29, %s993_s27 }
  0x5c   : > { %v854_v25 = vpack.c.bf16 %v253_v24, %v252_v23  ;;  %v1257_v27 = vld [vmem:[%s1235_s26 + $0x88] sm:$0xff]  ;;  %v1263_v29 = vld [vmem:[%s1235_s26 + $0x90] sm:$0xff]  ;;  %v1270_v30 = vld [vmem:[%s1235_s26 + $0x18] sm:$0xff]  ;;  %p996_p8 = pneg %p995_p6 }
  0x5d   : > { %833 = vmatpush3.bf16.msra.mxu0 %v830_v5  ;;  %867 = vmatpush3.bf16.msra.mxu1 %v830_v5  ;;  %v1273_v31 = vld [vmem:[%s1235_s26 + $0x98] sm:$0xff]  ;;  %v1276_v32 = vld [vmem:[%s1235_s26 + $0x20] sm:$0xff]  ;;  %v1286_v34 = vld [vmem:[%s1235_s26 + $0x28] sm:$0xff]  ;;  %p1002_p3 = por %p1001_p13, %p1000_p11 }
  0x5e   : > { %835 = vmatprep.subr.bf16.mxu0 %v834_v8  ;;  %860 = vmatprep.subr.bf16.mxu1 %v834_v8  ;;  %v1279_v33 = vld [vmem:[%s1235_s26 + $0xa0] sm:$0xff]  ;;  %v1289_v35 = vld [vmem:[%s1235_s26 + $0xa8] sm:$0xff]  ;;  %v1292_v36 = vld [vmem:[%s1235_s26 + $0x30] sm:$0xff] }
  0x5f   : > { %v1295_v37 = vld [vmem:[%s1235_s26 + $0xb0] sm:$0xff]  ;;  %v1302_v38 = vld [vmem:[%s1235_s26 + $0x38] sm:$0xff]  ;;  %v1308_v40 = vld [vmem:[%s1235_s26 + $0x40] sm:$0xff]  ;;  %p1003_p7 = pnand %p1002_p3, %p996_p8 }
  0x60   : > { %v1305_v39 = vld [vmem:[%s1235_s26 + $0xb8] sm:$0xff]  ;;  %v1311_v41 = vld [vmem:[%s1235_s26 + $0xc0] sm:$0xff]  ;;  %v1318_v42 = vld [vmem:[%s1235_s26 + $0x48] sm:$0xff] }
  0x61   : > { %837 = vmatpush3.bf16.msra.mxu0 %v834_v8  ;;  %868 = vmatpush3.bf16.msra.mxu1 %v834_v8  ;;  %v1321_v43 = vld [vmem:[%s1235_s26 + $0xc8] sm:$0xff]  ;;  %v1324_v44 = vld [vmem:[%s1235_s26 + $0x50] sm:$0xff]  ;;  %v1334_v46 = vld [vmem:[%s1235_s26 + $0x58] sm:$0xff] }
  0x62   : > { %839 = vmatprep.subr.bf16.mxu0 %v838_v13  ;;  %861 = vmatprep.subr.bf16.mxu1 %v838_v13  ;;  %v1327_v45 = vld [vmem:[%s1235_s26 + $0xd0] sm:$0xff]  ;;  %v1337_v47 = vld [vmem:[%s1235_s26 + $0xd8] sm:$0xff]  ;;  %v1340_v48 = vld [vmem:[%s1235_s26 + $0x60] sm:$0xff] }
  0x63   : > { %v1343_v49 = vld [vmem:[%s1235_s26 + $0xe0] sm:$0xff]  ;;  %v1350_v50 = vld [vmem:[%s1235_s26 + $0x68] sm:$0xff]  ;;  %v1356_v52 = vld [vmem:[%s1235_s26 + $0x70] sm:$0xff] }
  0x64   : > { %v1353_v51 = vld [vmem:[%s1235_s26 + $0xe8] sm:$0xff]  ;;  %v1359_v53 = vld [vmem:[%s1235_s26 + $0xf0] sm:$0xff]  ;;  %v1366_v54 = vld [vmem:[%s1235_s26 + $0x78] sm:$0xff] }
  0x65   : > { %841 = vmatpush3.bf16.msra.mxu0 %v838_v13  ;;  %869 = vmatpush3.bf16.msra.mxu1 %v838_v13  ;;  %v1369_v55 = vld [vmem:[%s1235_s26 + $0xf8] sm:$0xff]  ;;  %v1376_v57 = vld [vmem:[%s1530_s2] ss:$0 sm:$0xff] }
  0x66   : > { %843 = vmatprep.subr.bf16.mxu0 %v842_v16  ;;  %862 = vmatprep.subr.bf16.mxu1 %v842_v16 }
  0x69   : > { %845 = vmatpush3.bf16.msra.mxu0 %v842_v16  ;;  %870 = vmatpush3.bf16.msra.mxu1 %v842_v16 }
  0x6a   : > { %847 = vmatprep.subr.bf16.mxu0 %v846_v19  ;;  %863 = vmatprep.subr.bf16.mxu1 %v846_v19 }
  0x6d   : > { %849 = vmatpush3.bf16.msra.mxu0 %v846_v19  ;;  %871 = vmatpush3.bf16.msra.mxu1 %v846_v19 }
  0x6e   : > { %851 = vmatprep.subr.bf16.mxu0 %v850_v22  ;;  %864 = vmatprep.subr.bf16.mxu1 %v850_v22 }
  0x71   : > { %853 = vmatpush3.bf16.msra.mxu0 %v850_v22  ;;  %872 = vmatpush3.bf16.msra.mxu1 %v850_v22 }
  0x72   : > { %855 = vmatprep.subr.bf16.mxu0 %v854_v25  ;;  %865 = vmatprep.subr.bf16.mxu1 %v854_v25 }
  0x75   : > { %857 = vmatpush3.bf16.msra.mxu0 %v854_v25  ;;  %873 = vmatpush3.bf16.msra.mxu1 %v854_v25 }
  0x78   : > { %779 = vmatmul.mubr.f32.vlgmr.msra.gmra.mrb[0].mxu0 %v1254_v26  ;;  %803 = vmatmul.mubr.f32.vlgmr.msra.gmra.mrb[0].mxu1 %v1257_v27 }
  0x79   : > { %781 = vmatprep.mubr.f32.mxu0 %v1260_v28  ;;  %805 = vmatprep.mubr.f32.mxu1 %v1263_v29 }
  0x7c   : > { %782 = vmatmul.mubr.f32.gmra.mrb[2].mxu0 %v1270_v30  ;;  %806 = vmatmul.mubr.f32.gmra.mrb[2].mxu1 %v1273_v31 }
  0x7d   : > { %784 = vmatprep.mubr.f32.mxu0 %v1276_v32  ;;  %808 = vmatprep.mubr.f32.mxu1 %v1279_v33 }
  0x80   : > { %785 = vmatmul.mubr.f32.gmra.mrb[4].mxu0 %v1286_v34  ;;  %809 = vmatmul.mubr.f32.gmra.mrb[4].mxu1 %v1289_v35 }
  0x81   : > { %787 = vmatprep.mubr.f32.mxu0 %v1292_v36  ;;  %811 = vmatprep.mubr.f32.mxu1 %v1295_v37 }
  0x84   : > { %788 = vmatmul.mubr.f32.gmra.mrb[6].mxu0 %v1302_v38  ;;  %812 = vmatmul.mubr.f32.gmra.mrb[6].mxu1 %v1305_v39 }
  0x85   : > { %790 = vmatprep.mubr.f32.mxu0 %v1308_v40  ;;  %814 = vmatprep.mubr.f32.mxu1 %v1311_v41 }
  0x88   : > { %791 = vmatmul.mubr.f32.gmra.mrb[8].mxu0 %v1318_v42  ;;  %815 = vmatmul.mubr.f32.gmra.mrb[8].mxu1 %v1321_v43 }
  0x89   : > { %793 = vmatprep.mubr.f32.mxu0 %v1324_v44  ;;  %817 = vmatprep.mubr.f32.mxu1 %v1327_v45 }
  0x8c   : > { %794 = vmatmul.mubr.f32.gmra.mrb[10].mxu0 %v1334_v46  ;;  %818 = vmatmul.mubr.f32.gmra.mrb[10].mxu1 %v1337_v47 }
  0x8d   : > { %796 = vmatprep.mubr.f32.mxu0 %v1340_v48  ;;  %820 = vmatprep.mubr.f32.mxu1 %v1343_v49 }
  0x90   : > { %797 = vmatmul.mubr.f32.gmra.mrb[12].mxu0 %v1350_v50  ;;  %821 = vmatmul.mubr.f32.gmra.mrb[12].mxu1 %v1353_v51 }
  0x91   : > { %799 = vmatprep.mubr.f32.mxu0 %v1356_v52  ;;  %823 = vmatprep.mubr.f32.mxu1 %v1359_v53 }
  0x94   : > { %800 = vmatmul.mubr.f32.gmra.mrb[14].mxu0 %v1366_v54  ;;  %824 = vmatmul.mubr.f32.gmra.mrb[14].mxu1 %v1369_v55 }
 0x14b   : > { %v780_v56 = vpop.f32.mrb[0].mxu0  ;;  %v804_v58 = vpop.f32.mrb[0].mxu1 }
 0x14c   : > { %v480_v59 = vadd.f32 %v780_v56, %v1254_v26  ;;  %v496_v60 = vadd.f32 %v804_v58, %v1257_v27  ;;  %v320_v61 = vpop.f32.mrb[1].mxu0  ;;  %v400_v62 = vpop.f32.mrb[1].mxu1 }
 0x14d   : > { %v479_v63 = vadd.f32 %v320_v61, %v1246_v9  ;;  %v495_v0 = vadd.f32 %v400_v62, %v1249_v10 }
 0x14e   : > { %v519_v1 = vadd.f32 %v1376_v57, %v480_v59  ;;  %v535_v2 = vadd.f32 %v1376_v57, %v496_v60 }
 0x14f   : > { %v518_v3 = vadd.f32 %v1376_v57, %v479_v63  ;;  %v534_v4 = vadd.f32 %v1376_v57, %v495_v0  ;;  %v783_v5 = vpop.f32.mrb[2].mxu0  ;;  %v807_v6 = vpop.f32.mrb[2].mxu1 }
 0x150   : > { %551 = vst [vmem:[%s1388_s8 + $0x8] sm:$0xff] %v519_v1  ;;  %567 = vst [vmem:[%s1388_s8 + $0x88] sm:$0xff] %v535_v2  ;;  %v482_v7 = vadd.f32 %v783_v5, %v1270_v30  ;;  %v498_v8 = vadd.f32 %v807_v6, %v1273_v31  ;;  %v330_v9 = vpop.f32.mrb[3].mxu0  ;;  %v410_v10 = vpop.f32.mrb[3].mxu1 }
 0x151   : > { %550 = vst [vmem:[%s1388_s8] sm:$0xff] %v518_v3  ;;  %566 = vst [vmem:[%s1388_s8 + $0x80] sm:$0xff] %v534_v4  ;;  %v481_v11 = vadd.f32 %v330_v9, %v1260_v28  ;;  %v497_v12 = vadd.f32 %v410_v10, %v1263_v29 }
 0x152   : > { %v521_v13 = vadd.f32 %v1376_v57, %v482_v7  ;;  %v537_v14 = vadd.f32 %v1376_v57, %v498_v8 }
 0x153   : > { %v520_v15 = vadd.f32 %v1376_v57, %v481_v11  ;;  %v536_v16 = vadd.f32 %v1376_v57, %v497_v12  ;;  %v786_v17 = vpop.f32.mrb[4].mxu0  ;;  %v810_v18 = vpop.f32.mrb[4].mxu1 }
 0x154   : > { %553 = vst [vmem:[%s1388_s8 + $0x18] sm:$0xff] %v521_v13  ;;  %569 = vst [vmem:[%s1388_s8 + $0x98] sm:$0xff] %v537_v14  ;;  %v484_v19 = vadd.f32 %v786_v17, %v1286_v34  ;;  %v500_v20 = vadd.f32 %v810_v18, %v1289_v35  ;;  %v340_v21 = vpop.f32.mrb[5].mxu0  ;;  %v420_v22 = vpop.f32.mrb[5].mxu1 }
 0x155   : > { %552 = vst [vmem:[%s1388_s8 + $0x10] sm:$0xff] %v520_v15  ;;  %568 = vst [vmem:[%s1388_s8 + $0x90] sm:$0xff] %v536_v16  ;;  %v483_v23 = vadd.f32 %v340_v21, %v1276_v32  ;;  %v499_v24 = vadd.f32 %v420_v22, %v1279_v33 }
 0x156   : > { %v523_v25 = vadd.f32 %v1376_v57, %v484_v19  ;;  %v539_v26 = vadd.f32 %v1376_v57, %v500_v20 }
 0x157   : > { %v522_v27 = vadd.f32 %v1376_v57, %v483_v23  ;;  %v538_v28 = vadd.f32 %v1376_v57, %v499_v24  ;;  %v789_v29 = vpop.f32.mrb[6].mxu0  ;;  %v813_v30 = vpop.f32.mrb[6].mxu1 }
 0x158   : > { %555 = vst [vmem:[%s1388_s8 + $0x28] sm:$0xff] %v523_v25  ;;  %571 = vst [vmem:[%s1388_s8 + $0xa8] sm:$0xff] %v539_v26  ;;  %v486_v31 = vadd.f32 %v789_v29, %v1302_v38  ;;  %v502_v32 = vadd.f32 %v813_v30, %v1305_v39  ;;  %v350_v34 = vpop.f32.mrb[7].mxu0  ;;  %v430_v33 = vpop.f32.mrb[7].mxu1 }
 0x159   : > { %554 = vst [vmem:[%s1388_s8 + $0x20] sm:$0xff] %v522_v27  ;;  %570 = vst [vmem:[%s1388_s8 + $0xa0] sm:$0xff] %v538_v28  ;;  %v485_v35 = vadd.f32 %v350_v34, %v1292_v36  ;;  %v501_v56 = vadd.f32 %v430_v33, %v1295_v37 }
 0x15a   : > { %v525_v58 = vadd.f32 %v1376_v57, %v486_v31  ;;  %v541_v59 = vadd.f32 %v1376_v57, %v502_v32 }
 0x15b   : > { %v524_v60 = vadd.f32 %v1376_v57, %v485_v35  ;;  %v540_v38 = vadd.f32 %v1376_v57, %v501_v56  ;;  %v792_v61 = vpop.f32.mrb[8].mxu0  ;;  %v816_v39 = vpop.f32.mrb[8].mxu1 }
 0x15c   : > { %557 = vst [vmem:[%s1388_s8 + $0x38] sm:$0xff] %v525_v58  ;;  %573 = vst [vmem:[%s1388_s8 + $0xb8] sm:$0xff] %v541_v59  ;;  %v488_v62 = vadd.f32 %v792_v61, %v1318_v42  ;;  %v504_v36 = vadd.f32 %v816_v39, %v1321_v43  ;;  %v360_v63 = vpop.f32.mrb[9].mxu0  ;;  %v440_v37 = vpop.f32.mrb[9].mxu1 }
 0x15d   : > { %556 = vst [vmem:[%s1388_s8 + $0x30] sm:$0xff] %v524_v60  ;;  %572 = vst [vmem:[%s1388_s8 + $0xb0] sm:$0xff] %v540_v38  ;;  %v487_v0 = vadd.f32 %v360_v63, %v1308_v40  ;;  %v503_v1 = vadd.f32 %v440_v37, %v1311_v41 }
 0x15e   : > { %v527_v2 = vadd.f32 %v1376_v57, %v488_v62  ;;  %v543_v3 = vadd.f32 %v1376_v57, %v504_v36 }
 0x15f   : > { %v526_v4 = vadd.f32 %v1376_v57, %v487_v0  ;;  %v542_v42 = vadd.f32 %v1376_v57, %v503_v1  ;;  %v795_v5 = vpop.f32.mrb[10].mxu0  ;;  %v819_v43 = vpop.f32.mrb[10].mxu1 }
 0x160   : > { %559 = vst [vmem:[%s1388_s8 + $0x48] sm:$0xff] %v527_v2  ;;  %575 = vst [vmem:[%s1388_s8 + $0xc8] sm:$0xff] %v543_v3  ;;  %v490_v6 = vadd.f32 %v795_v5, %v1334_v46  ;;  %v506_v40 = vadd.f32 %v819_v43, %v1337_v47  ;;  %v370_v7 = vpop.f32.mrb[11].mxu0  ;;  %v450_v41 = vpop.f32.mrb[11].mxu1 }
 0x161   : > { %558 = vst [vmem:[%s1388_s8 + $0x40] sm:$0xff] %v526_v4  ;;  %574 = vst [vmem:[%s1388_s8 + $0xc0] sm:$0xff] %v542_v42  ;;  %v489_v8 = vadd.f32 %v370_v7, %v1324_v44  ;;  %v505_v9 = vadd.f32 %v450_v41, %v1327_v45 }
 0x162   : > { %v529_v10 = vadd.f32 %v1376_v57, %v490_v6  ;;  %v545_v11 = vadd.f32 %v1376_v57, %v506_v40 }
 0x163   : > { %v528_v12 = vadd.f32 %v1376_v57, %v489_v8  ;;  %v544_v46 = vadd.f32 %v1376_v57, %v505_v9  ;;  %v798_v13 = vpop.f32.mrb[12].mxu0  ;;  %v822_v47 = vpop.f32.mrb[12].mxu1 }
 0x164   : > { %561 = vst [vmem:[%s1388_s8 + $0x58] sm:$0xff] %v529_v10  ;;  %577 = vst [vmem:[%s1388_s8 + $0xd8] sm:$0xff] %v545_v11  ;;  %v492_v14 = vadd.f32 %v798_v13, %v1350_v50  ;;  %v508_v44 = vadd.f32 %v822_v47, %v1353_v51  ;;  %v380_v45 = vpop.f32.mrb[13].mxu0  ;;  %v460_v15 = vpop.f32.mrb[13].mxu1 }
 0x165   : > { %560 = vst [vmem:[%s1388_s8 + $0x50] sm:$0xff] %v528_v12  ;;  %576 = vst [vmem:[%s1388_s8 + $0xd0] sm:$0xff] %v544_v46  ;;  %v491_v16 = vadd.f32 %v380_v45, %v1340_v48  ;;  %v507_v17 = vadd.f32 %v460_v15, %v1343_v49 }
 0x166   : > { %v531_v18 = vadd.f32 %v1376_v57, %v492_v14  ;;  %v547_v19 = vadd.f32 %v1376_v57, %v508_v44 }
 0x167   : > { %v530_v50 = vadd.f32 %v1376_v57, %v491_v16  ;;  %v546_v20 = vadd.f32 %v1376_v57, %v507_v17  ;;  %v801_v51 = vpop.f32.mrb[14].mxu0  ;;  %v825_v21 = vpop.f32.mrb[14].mxu1 }
 0x168   : > { %563 = vst [vmem:[%s1388_s8 + $0x68] sm:$0xff] %v531_v18  ;;  %579 = vst [vmem:[%s1388_s8 + $0xe8] sm:$0xff] %v547_v19  ;;  %v494_v48 = vadd.f32 %v801_v51, %v1366_v54  ;;  %v510_v49 = vadd.f32 %v825_v21, %v1369_v55  ;;  %v390_v22 = vpop.f32.mrb[15].mxu0  ;;  %v470_v23 = vpop.f32.mrb[15].mxu1 }
 0x169   : > { %562 = vst [vmem:[%s1388_s8 + $0x60] sm:$0xff] %v530_v50  ;;  %578 = vst [vmem:[%s1388_s8 + $0xe0] sm:$0xff] %v546_v20  ;;  %v493_v24 = vadd.f32 %v390_v22, %v1356_v52  ;;  %v509_v25 = vadd.f32 %v470_v23, %v1359_v53 }
 0x16a   : > { %v533_v26 = vadd.f32 %v1376_v57, %v494_v48  ;;  %v549_v27 = vadd.f32 %v1376_v57, %v510_v49 }
 0x16b   : > { %v532_v54 = vadd.f32 %v1376_v57, %v493_v24  ;;  %v548_v52 = vadd.f32 %v1376_v57, %v509_v25 }
 0x16c   : > { %565 = vst [vmem:[%s1388_s8 + $0x78] sm:$0xff] %v533_v26  ;;  %581 = vst [vmem:[%s1388_s8 + $0xf8] sm:$0xff] %v549_v27 }
 0x16d   : > { %564 = vst [vmem:[%s1388_s8 + $0x70] sm:$0xff] %v532_v54  ;;  %580 = vst [vmem:[%s1388_s8 + $0xf0] sm:$0xff] %v548_v52 }
 0x16e   : > { %1006 = shalt.err (!%p1003_p7)
}
 0x16f   : > { %s1007_s30 = scalar_lea.hbm %s1477_s5, 4096  ;;  %s1011_s10 = scalar_lea.hbm %s1531_s3, 16384 }
 0x170   : > { %p1008_p9 = scmp.ne.s32.totalorder %s1477_s5, %s1007_s30  ;;  %p1012_p5 = scmp.lt.u32.totalorder %s1477_s5, %s1531_s3 }
 0x171   : > { %p1013_p10 = scmp.lt.u32.totalorder %s1011_s10, %s1007_s30  ;;  %p1015_p4 = scmp.lt.u32.totalorder %s1007_s30, %s1477_s5 }
 0x172   : > { %p1009_p1 = pnand %p1008_p9, %p1178_p12 }
 0x173   : > { %p1014_p2 = por %p1013_p10, %p1012_p5 }
 0x174   : > { %p1010_p0 = pneg %p1009_p1 }
 0x175   : > { %p1016_p6 = por %p1015_p4, %p1014_p2 }
 0x177   : > { %p1017_p8 = pnand %p1016_p6, %p1010_p0 }
 0x179   : > { %1020 = shalt.err (!%p1017_p8)
}
 0x17a   : > { %s1070_s20 = smov 128   ;;  %s1071_s8 = smov 8  }
 0x17b   : > { %880 = dma.vmem_to_hbm [thread:$0]  (%p1178_p12), %s1479_s4, 4096, %s1477_s5, %s583_s11, %s1070_s20, %s1070_s20, %s1071_s8  }
 0x17c PF: > { %p897_p11 = scmp.ge.s32.totalorder %s1063_s15, 2  ;;  %s611_s9 = sand.u32 1, %s1051_s12  }
 0x17d   : > { %p1546_p13 = scmp.ne.s32.totalorder %s1536_s19, 0  ;;  %s612_s16 = scalar_lea.sflag [#allocation4], %s611_s9 }
 0x17f   : > { %p891_p3 = pnand %p897_p11, %p1546_p13 }
 0x181   : > { %1046 = dma.done.wait (!%p891_p3), %s612_s16, 4096  }
 0x182   : > { %1048 = vsyncadd (!%p891_p3), %s612_s16, 4294963200  ;;  %p17_p7 = scmp.ge.s32.totalorder %s1145_s24, 6   ;;  %s1547_s12 = smov %s1055_s13 }
 0x183   : > { %s1548_s13 = smov %s1059_s14  ;;  %s1549_s14 = smov %s1174_s17 }
 0x184   : > { %s1550_s15 = smov %s1145_s24  ;;  %19 = sbr.rel (!%p17_p7) target bundleno = 6 (0x6), region = 81 }
 0x18b   :  { %617 = vsyncpa [#allocation3], 1 }
 0x18c   :  { %619 = vsyncpa [#allocation3 + $0x1], 1 }
 0x18d   :  { %620 = vsyncpa [#allocation6], 1 }
 0x18e   :  { %621 = vsyncpa [#allocation4], 1 }
 0x18f   :  { %623 = vsyncpa [#allocation4 + $0x1], 1 }

</bundles_post_ra>
